<compile_context>
chip_gen: v6e
topology: v6e:2x2x1
jax: 0.10.0
libtpu: 0.0.40
codegen_flags: <defaults>
</compile_context>

<pallas_src>
import functools

import jax
import jax.numpy as jnp
from jax.experimental import pallas as pl
from jax.experimental.pallas import tpu as pltpu


def _round_up(x, m):
    return ((x + m - 1) // m) * m


# Budgets sized for the smallest scoped-VMEM default across generations
# (v5e: 16 MiB; v6e/v7x: 32 MiB scoped, v7x: 64 MiB physical per TC).
_VMEM_BUDGET = 12 * 1024 * 1024          # total pipeline budget (with headroom)
_W_RESIDENT_BUDGET = 8 * 1024 * 1024     # double-buffered weight-block budget
_W_SINGLE_BUFFER_MIN = 2 * 1024 * 1024   # single-buffer W once it matters


def relation_aware_kernel(x_ref, w_ref, b_ref, o_ref):
    # x_ref: (tn, d_in)  row tile of src
    # w_ref: (d_in, td)  tile of 2*W^T   (resident across the row axis)
    # b_ref: (1, td)     tile of 2*b
    # out  = tanh(src @ (2 W^T) + 2 b)  ==  tanh(s + d + (s - d))
    acc = jnp.dot(x_ref[...], w_ref[...], preferred_element_type=jnp.float32)
    o_ref[...] = jnp.tanh(acc + b_ref[...].astype(jnp.float32)).astype(o_ref.dtype)


def prepare_params(weight, bias):
    """Fold the exact factor 2 into the Linear params (do once at init time).

    2*(x @ W^T + b) == x @ (2*W)^T + 2*b bit-for-bit (power-of-two scale).
    Params keep their own dtype (no downcast to the activation dtype).
    """
    w2 = (2.0 * weight).T                 # (d_in, d_out)
    b2 = (2.0 * bias).reshape(1, -1)      # (1, d_out)
    return w2, b2


def relation_aware_prepared(src, w2, b2, *, tile_n=2048, out_dtype=None):
    d_in, d_out = w2.shape
    lead = src.shape[:-1]
    out_dtype = src.dtype if out_dtype is None else jnp.dtype(out_dtype)

    x = src.reshape(-1, d_in)
    n = x.shape[0]
    if n == 0:  # empty-batch edge case
        return jnp.zeros((*lead, d_out), out_dtype)

    x_item = x.dtype.itemsize
    w_item = w2.dtype.itemsize
    o_item = jnp.dtype(out_dtype).itemsize

    # ---- d_out column tiling: keep W fully resident unless it would blow
    # VMEM (v7x: 64 MiB/TC physical; v5e: 16 MiB scoped default). ----
    if 2 * d_in * d_out * w_item <= _W_RESIDENT_BUDGET:
        td = d_out                                     # whole d_out, 1 column step
    else:
        td = ((_W_RESIDENT_BUDGET // 2) // (d_in * w_item)) // 128 * 128
        td = max(128, td)                              # lane-aligned column tile
        # TODO(synk): add a d_in reduction grid axis + f32 accumulator scratch
        # if d_in alone is so large that even a 128-wide W column tile does not
        # fit the budget.
    cols = pl.cdiv(d_out, td)

    # ---- Row tiling: biggest tile that fits a double-buffered pipeline in
    # the VMEM budget; at least 2 grid steps when there are enough rows so the
    # second TensorCore (v7x megacore) has work. ----
    tn = max(8, _round_up(min(tile_n, _round_up(n, 8)), 8))
    fixed = 2 * (d_in * td + td) * w_item              # W + b blocks (x2 buffers)
    per_row = 2 * (d_in * x_item + td * o_item)        # x + out tiles (x2 buffers)
    while tn > 8 and fixed + per_row * tn > _VMEM_BUDGET:
        tn = max(8, _round_up(tn // 2, 8))
    if pl.cdiv(n, tn) == 1 and n >= 1024:
        tn = max(8, _round_up(pl.cdiv(n, 2), 8))
    rows = pl.cdiv(n, tn)

    # Constant-index weight block: single-buffer it once it is large enough
    # that halving its VMEM footprint matters (default double-buffering buys
    # nothing for a block whose index never changes).
    w_kwargs = {}
    if cols == 1 and d_in * td * w_item >= _W_SINGLE_BUFFER_MIN:
        w_kwargs = dict(pipeline_mode=pl.Buffered(1))

    out = pl.pallas_call(
        relation_aware_kernel,
        out_shape=jax.ShapeDtypeStruct((n, d_out), out_dtype),
        grid_spec=pltpu.PrefetchScalarGridSpec(
            num_scalar_prefetch=0,
            grid=(rows, cols),
            in_specs=[
                pl.BlockSpec((tn, d_in), lambda i, j: (i, 0)),              # src rows
                pl.BlockSpec((d_in, td), lambda i, j: (0, j), **w_kwargs),  # 2*W^T
                pl.BlockSpec((1, td), lambda i, j: (0, j)),                 # 2*b
            ],
            out_specs=pl.BlockSpec((tn, td), lambda i, j: (i, j)),
        ),
        compiler_params=pltpu.CompilerParams(
            dimension_semantics=("parallel", "parallel"),  # shard across TCs (v7x)
        ),
    )(x, w2, b2)

    return out.reshape(*lead, d_out)


def relation_aware(src, dst, weight, bias, *, tile_n=2048, out_dtype=None):
    """RelationAware.forward.  `dst` is accepted for API parity but unused."""
    del dst  # tanh(s + d + (s - d)) == tanh(2*s): output independent of dst.
    w2, b2 = prepare_params(weight, bias)
    return relation_aware_prepared(src, w2, b2, tile_n=tile_n, out_dtype=out_dtype)


def relation_aware_ref(src, dst, weight, bias):
    # Faithful transcription of the PyTorch forward.
    s = src @ weight.T + bias
    d = dst @ weight.T + bias
    return jnp.tanh(s + d + (s - d))


if __name__ == "__main__":
    # Small shapes consistent with the module: batch=2, seq=8, hidden=32.
    batch, seq, d_in, d_out = 2, 8, 32, 32

    key = jax.random.PRNGKey(0)
    k_src, k_dst, k_w, k_b = jax.random.split(key, 4)
    src = jax.random.normal(k_src, (batch, seq, d_in), dtype=jnp.float32)
    dst = jax.random.normal(k_dst, (batch, seq, d_in), dtype=jnp.float32)

    # Deterministic Linear(input_dim, output_dim) params (PyTorch-style init).
    bound = 1.0 / (d_in ** 0.5)
    weight = jax.random.uniform(k_w, (d_out, d_in), jnp.float32, -bound, bound)
    bias = jax.random.uniform(k_b, (d_out,), jnp.float32, -bound, bound)

    # TODO(synk): nn.Dropout is declared in the module but never applied in
    # forward(), so no dropout is implemented (matches eval semantics).

    # jit the whole wrapper so parameter prep fuses with / hoists around the
    # kernel instead of issuing separate HBM passes per call.
    fwd = jax.jit(relation_aware)
    out = jax.block_until_ready(fwd(src, dst, weight, bias))
    ref = relation_aware_ref(src, dst, weight, bias)
    assert out.shape == (batch, seq, d_out)
    assert jnp.allclose(out, ref, atol=1e-5, rtol=1e-5), "mismatch vs reference"

    # Ragged-edge check: row count (15) not a multiple of the row tile (8)
    # exercises Pallas's padded-read / masked-write handling of the last block.
    src_r = jax.random.normal(k_src, (3, 5, d_in), dtype=jnp.float32)
    dst_r = jax.random.normal(k_dst, (3, 5, d_in), dtype=jnp.float32)
    fwd_r = jax.jit(functools.partial(relation_aware, tile_n=8))
    out_r = jax.block_until_ready(fwd_r(src_r, dst_r, weight, bias))
    ref_r = relation_aware_ref(src_r, dst_r, weight, bias)
    assert out_r.shape == (3, 5, d_out)
    assert jnp.allclose(out_r, ref_r, atol=1e-5, rtol=1e-5), "ragged mismatch"

    print("KERNEL_OK")
</pallas_src>

<mosaic_0001>
module attributes {stable_mosaic.version = 11 : i64} {
  func.func @relation_aware_kernel(%arg0: i32, %arg1: i32, %arg2: memref<16x32xf32, #tpu.memory_space<vmem>>, %arg3: memref<32x32xf32, #tpu.memory_space<vmem>>, %arg4: memref<1x32xf32, #tpu.memory_space<vmem>>, %arg5: memref<16x32xf32, #tpu.memory_space<vmem>>) attributes {dimension_semantics = [#tpu.dimension_semantics<parallel>, #tpu.dimension_semantics<parallel>], iteration_bounds = array<i64: 1, 1>, scalar_prefetch = 0 : i64, scratch_operands = 0 : i64, tpu.core_type = #tpu.core_type<tc>, window_params = [{transform_indices = @transform_0, window_bounds = array<i64: 16, 32>}, {transform_indices = @transform_1, window_bounds = array<i64: 32, 32>}, {transform_indices = @transform_2, window_bounds = array<i64: 1, 32>}, {transform_indices = @transform_3, window_bounds = array<i64: 16, 32>}]} {
    %c0 = arith.constant 0 : index
    %c0_0 = arith.constant 0 : index
    %0 = vector.load %arg2[%c0, %c0_0] : memref<16x32xf32, #tpu.memory_space<vmem>>, vector<16x32xf32>
    %c0_1 = arith.constant 0 : index
    %c0_2 = arith.constant 0 : index
    %1 = vector.load %arg3[%c0_1, %c0_2] : memref<32x32xf32, #tpu.memory_space<vmem>>, vector<32x32xf32>
    %cst = arith.constant dense<0.000000e+00> : vector<16x32xf32>
    %2 = tpu.matmul %0, %1, %cst {dimension_numbers = #tpu.dot_dimension_numbers<[1], [0], [0], [1], [0, 0, 1, 1], [], []>} : vector<16x32xf32>, vector<32x32xf32>, vector<16x32xf32> -> vector<16x32xf32>
    %c0_3 = arith.constant 0 : index
    %c0_4 = arith.constant 0 : index
    %3 = vector.load %arg4[%c0_3, %c0_4] : memref<1x32xf32, #tpu.memory_space<vmem>>, vector<1x32xf32>
    %4 = vector.broadcast %3 : vector<1x32xf32> to vector<16x32xf32>
    %5 = arith.addf %2, %4 : vector<16x32xf32>
    %6 = math.tanh %5 : vector<16x32xf32>
    %c0_5 = arith.constant 0 : index
    %c0_6 = arith.constant 0 : index
    %7 = vector.load %arg5[%c0_5, %c0_6] : memref<16x32xf32, #tpu.memory_space<vmem>>, vector<16x32xf32>
    tpu.vector_store %arg5[%c0_5, %c0_6], %6 {strides = array<i32>} : memref<16x32xf32, #tpu.memory_space<vmem>>, vector<16x32xf32>,
    return
  }
  func.func @transform_0(%arg0: i32, %arg1: i32) -> (i32, i32) {
    %c0_i32 = arith.constant 0 : i32
    %c0_i32_0 = arith.constant 0 : i32
    return %arg0, %c0_i32 : i32, i32
  }
  func.func @transform_1(%arg0: i32, %arg1: i32) -> (i32, i32) {
    %c0_i32 = arith.constant 0 : i32
    %c0_i32_0 = arith.constant 0 : i32
    return %c0_i32, %arg1 : i32, i32
  }
  func.func @transform_2(%arg0: i32, %arg1: i32) -> (i32, i32) {
    %c0_i32 = arith.constant 0 : i32
    %c0_i32_0 = arith.constant 0 : i32
    return %c0_i32, %arg1 : i32, i32
  }
  func.func @transform_3(%arg0: i32, %arg1: i32) -> (i32, i32) {
    %c0_i32 = arith.constant 0 : i32
    return %arg0, %arg1 : i32, i32
  }
}

</mosaic_0001>

<bundles_post_ra>
// kernel: relation_aware.1
= control target key start
LH: loop header
LB: loop body
LE: loop exit
PB: predicated region body
PF: predicated region fallthrough
CT: control target
= control target key end

     0   :  { %vm28_vm0 = vcmask 261120   ;;  %s230_s0 = inlined_call_operand.vmem [shape: f32[16,32], index: 0, kind: input, shape index: {}]   ;;  %s231_s1 = inlined_call_operand.vmem [shape: f32[32,32], index: 1, kind: input, shape index: {}]   ;;  %s232_s2 = inlined_call_operand.vmem [shape: f32[1,32], index: 2, kind: input, shape index: {}]   ;;  %s233_s3 = inlined_call_operand.hbm [shape: f32[16,32], index: 3, kind: output, shape index: {}]  }
   0x1   :  { %v20_v0 = vld [vmem:[%s231_s1 + $0x18] sm:$0xff]  ;;  %v19_v1 = vld [vmem:[%s231_s1 + $0x10] sm:$0xff]  ;;  %v15_v2 = vld [vmem:[%s230_s0] sm:$0xff] }
   0x2   :  { %139 = vmatprep.subr.mxu0 %v20_v0  ;;  %v18_v3 = vld [vmem:[%s231_s1 + $0x8] sm:$0xff]  ;;  %147 = vmatprep.mubr.msk.f32.mxu0 %vm28_vm0, %v15_v2 }
   0x3   :  { %140 = vmatpush3.msra.mxu0 %v20_v0 }
   0x4   :  { %8 = vsyncpa [#allocation3], 0  ;;  %141 = vmatprep.subr.mxu0 %v19_v1  ;;  %v17_v4 = vld [vmem:[%s231_s1] sm:$0xff]  ;;  %v16_v5 = vld [vmem:[%s230_s0 + $0x8] sm:$0xff]  ;;  %s179_s1 = smov [#allocation2]  }
   0x5   :  { %142 = vmatpush3.msra.mxu0 %v19_v1  ;;  %v130_v6 = vld [vmem:[%s232_s2] ss:$0 sm:$0xff]  ;;  %s119_s26 = sshll.u32 %s179_s1, 4  ;;  %s120_s26 = int_to_ptr.vmem [resolvable:$true] %s119_s26 }
   0x6   :  { %143 = vmatprep.subr.mxu0 %v18_v3  ;;  %s157_s0 = scalar_lea.vmem %s120_s26, 256  ;;  %p162_p1 = scmp.lt.s32.totalorder %s120_s26, %s120_s26 }
   0x7   :  { %144 = vmatpush3.msra.mxu0 %v18_v3  ;;  %p158_p0 = scmp.ne.s32.totalorder %s120_s26, %s157_s0  ;;  %p163_p2 = scmp.lt.s32.totalorder %s157_s0, %s157_s0 }
   0x8   :  { %145 = vmatprep.subr.mxu0 %v17_v4 }
   0x9   :  { %146 = vmatpush3.msra.mxu0 %v17_v4  ;;  %p164_p3 = por %p163_p2, %p162_p1 }
   0xa   :  { %148 = vmatmul.mubr.msk.f32.vlgmr.msra.gmra.mxu0 %vm28_vm0, %v16_v5 }
   0xb   :  { %p165_p4 = pnand %p164_p3, %p158_p0 }
  0xca   :  { %v149_v7 = vpop.f32.mrf.mxu0 }
  0xcb   :  { %v107_v8 = vadd.f32 %v149_v7, %v130_v6 }
  0xcc   :  { %v101_v9 = vpop.f32.mrf.mxu0 }
  0xcd   :  { %153 = vtanh.f32 %v107_v8  ;;  %v102_v10 = vadd.f32 %v130_v6, %v101_v9 }
  0xcf   :  { %155 = vtanh.f32 %v102_v10 }
  0xda   :  { %v154_v11 = vpop.eup %153 }
  0xdb   :  { %113 = vst.msk [vmem:[#allocation2 + $0x8] sm:$0xff] %vm28_vm0, %v154_v11 }
  0xdc   :  { %v156_v12 = vpop.eup %155 }
  0xdd   :  { %112 = vst.msk [vmem:[#allocation2] sm:$0xff] %vm28_vm0, %v156_v12 }
  0xde   :  { %168 = shalt.err (!%p165_p4)
}
  0xdf   :  { %s180_s2 = smov 128   ;;  %s181_s27 = smov 8  }
  0xe0   :  { %125 = dma.vmem_to_hbm [thread:$0]  %s120_s26, 256, %s233_s3, [#allocation3], %s180_s2, %s180_s2, %s181_s27  }
  0xe1   :  { %177 = dma.done.wait [#allocation3], 256  }
  0xe2   :  { %178 = vsyncadd [#allocation3], 4294967040 }
  0xe3   :  { %129 = vsyncpa [#allocation3], 1 }

</bundles_post_ra>
